<compile_context>
chip_gen: v7x
topology: tpu7x:2x2x1
jax: 0.10.0
libtpu: 0.0.40
codegen_flags: <defaults>
</compile_context>

<pallas_src>
import functools

import jax
import jax.numpy as jnp
from jax.experimental import pallas as pl
from jax.experimental.pallas import tpu as pltpu


# ----------------------------- kernels --------------------------------------


def _qkv_proj_kernel(kin_ref, vin_ref, qin_ref,
                     wk_ref, bk_ref, wv_ref, bv_ref, wq_ref, bq_ref,
                     ko_ref, vo_ref, qo_ref):
    # nn.Linear: y = x @ W^T + b ; weights arrive pre-transposed to (in, out).
    ko_ref[...] = (jnp.dot(kin_ref[...], wk_ref[...],
                           preferred_element_type=jnp.float32)
                   + bk_ref[...]).astype(ko_ref.dtype)
    vo_ref[...] = (jnp.dot(vin_ref[...], wv_ref[...],
                           preferred_element_type=jnp.float32)
                   + bv_ref[...]).astype(vo_ref.dtype)
    qo_ref[...] = (jnp.dot(qin_ref[...], wq_ref[...],
                           preferred_element_type=jnp.float32)
                   + bq_ref[...]).astype(qo_ref.dtype)


def _attention_kernel(q_ref, k_ref, v_ref, ctx_ref, attn_ref, *, scale):
    q = q_ref[...]            # (TH, Lq, D)
    k = k_ref[...]            # (TH, Lk, D)
    v = v_ref[...]            # (TH, Lk, D)
    # scores with f32 accumulation on the MXU
    s = jnp.einsum("hqd,hkd->hqk", q, k, preferred_element_type=jnp.float32)
    s = s * scale
    # softmax over the key axis (PyTorch nn.Softmax(dim=2)) in f32
    m = jnp.max(s, axis=-1, keepdims=True)
    e = jnp.exp(s - m)
    denom = jnp.sum(e, axis=-1, keepdims=True)
    p = e * pl.reciprocal(denom, approx=True)     # EUP vrcp, off the VALU path
    # attention dropout p=0.0 -> identity
    ctx = jnp.einsum("hqk,hkd->hqd", p.astype(v.dtype), v,
                     preferred_element_type=jnp.float32)
    ctx_ref[...] = ctx.astype(ctx_ref.dtype)
    attn_ref[...] = p.astype(attn_ref.dtype)


def _final_kernel(ctx_ref, res_ref, wf_ref, bf_ref, gamma_ref, beta_ref, o_ref):
    y = jnp.dot(ctx_ref[...], wf_ref[...],
                preferred_element_type=jnp.float32) + bf_ref[...]
    # output dropout p=0.0 -> identity; squeeze(dim=1) is a no-op for L_q > 1
    z = res_ref[...].astype(jnp.float32) + y
    mean = jnp.mean(z, axis=-1, keepdims=True)
    var = jnp.mean((z - mean) * (z - mean), axis=-1, keepdims=True)
    zn = (z - mean) * jax.lax.rsqrt(var + 1e-5)
    o_ref[...] = (zn * gamma_ref[...] + beta_ref[...]).astype(o_ref.dtype)


# ----------------------------- helpers --------------------------------------


def _pick_row_block(n, dtype, cap=256):
    """Largest divisor of n (<= cap) that is a multiple of the packed sublane
    count for `dtype` AND leaves >= 2 grid steps (v7x megacore). Falls back to
    the full extent n (always layout-legal)."""
    itemsize = jnp.dtype(dtype).itemsize
    pack = 32 if itemsize == 1 else (16 if itemsize == 2 else 8)
    cands = [d for d in range(1, min(cap, n) + 1)
             if n % d == 0 and d % pack == 0 and d < n]
    return max(cands) if cands else n


def _pick_head_block(bh, cap=8):
    """Heads per attention grid step; prefer >= 2 grid steps."""
    cands = [d for d in range(1, min(cap, bh) + 1) if bh % d == 0 and d < bh]
    return max(cands) if cands else bh


_COMPILER_PARAMS = pltpu.CompilerParams(
    dimension_semantics=("parallel",),       # shard grid across v7x's 2 TCs
    vmem_limit_bytes=32 * 1024 * 1024,       # raise scoped VMEM (safe on v5e/v6e/v7x)
)


def prepare_mha_params(wk, bk, wv, bv, wq, bq, wf, bf, gamma, beta, *, compute_dtype):
    """One-time weight prep, hoisted out of the per-call path: transpose PyTorch
    nn.Linear weights (out,in) -> (in,out) so kernels do x @ W, cast weights to
    the activation dtype (e.g. bf16 weights for bf16 activations), keep
    biases / LayerNorm params in f32."""
    f32 = jnp.float32
    return dict(
        wk_t=jnp.asarray(wk.T, compute_dtype), bk=jnp.asarray(bk, f32).reshape(1, -1),
        wv_t=jnp.asarray(wv.T, compute_dtype), bv=jnp.asarray(bv, f32).reshape(1, -1),
        wq_t=jnp.asarray(wq.T, compute_dtype), bq=jnp.asarray(bq, f32).reshape(1, -1),
        wf_t=jnp.asarray(wf.T, compute_dtype), bf=jnp.asarray(bf, f32).reshape(1, -1),
        gamma=jnp.asarray(gamma, f32).reshape(1, -1),
        beta=jnp.asarray(beta, f32).reshape(1, -1),
    )


# ----------------------------- forward --------------------------------------


def multi_head_attention(key, value, query, params, *, num_heads,
                         row_block=256, head_block=8):
    """Pallas forward of the PyTorch MultiHeadAttention module.

    key/value/query: (B, L, model_dim).
    Returns (output (B, L, model_dim), attention (B*num_heads, L, L))."""
    # TODO(synk): cross-attention with differing key/query lengths and the
    # squeeze(dim=1) broadcasting edge case (L_q == 1) are not handled here.
    assert key.shape == value.shape == query.shape, (
        "fused projection path assumes equally-shaped key/value/query")
    B, L, model_dim = query.shape
    assert model_dim % num_heads == 0
    D = model_dim // num_heads
    N = B * L
    dt = query.dtype
    itemsize = jnp.dtype(dt).itemsize

    k2d = key.reshape(N, model_dim)
    v2d = value.reshape(N, model_dim)
    q2d = query.reshape(N, model_dim)

    # ---- kernel 1: fused K/V/Q projections ----------------------------------
    bn = _pick_row_block(N, dt, cap=row_block)
    row_spec = pl.BlockSpec((bn, model_dim), lambda i: (i, 0))
    w_spec = pl.BlockSpec((model_dim, model_dim), lambda i: (0, 0))
    b_spec = pl.BlockSpec((1, model_dim), lambda i: (0, 0))
    proj_cost = pl.CostEstimate(
        flops=3 * 2 * N * model_dim * model_dim,
        transcendentals=0,
        bytes_accessed=(6 * N * model_dim + 3 * model_dim * model_dim) * itemsize,
    )
    k_p, v_p, q_p = pl.pallas_call(
        _qkv_proj_kernel,
        out_shape=[jax.ShapeDtypeStruct((N, model_dim), dt)] * 3,
        grid_spec=pltpu.PrefetchScalarGridSpec(
            num_scalar_prefetch=0,
            grid=(N // bn,),
            in_specs=[row_spec, row_spec, row_spec,
                      w_spec, b_spec, w_spec, b_spec, w_spec, b_spec],
            out_specs=[row_spec, row_spec, row_spec],
        ),
        compiler_params=_COMPILER_PARAMS,
        cost_estimate=proj_cost,
    )(k2d, v2d, q2d,
      params["wk_t"], params["bk"],
      params["wv_t"], params["bv"],
      params["wq_t"], params["bq"])

    # ---- replicate the module's contiguous .view(B*H, L, D) -----------------
    BH = B * num_heads
    k3 = k_p.reshape(BH, L, D)
    v3 = v_p.reshape(BH, L, D)
    q3 = q_p.reshape(BH, L, D)

    # scale exactly as the PyTorch module computes it (raises if D < num_heads,
    # matching PyTorch's behavior).
    scale = float((D // num_heads) ** (-0.5))

    # ---- kernel 2: scaled dot-product attention ------------------------------
    th = _pick_head_block(BH, cap=head_block)
    qkv_spec = pl.BlockSpec((th, L, D), lambda i: (i, 0, 0))
    attn_cost = pl.CostEstimate(
        flops=2 * 2 * BH * L * L * D,
        transcendentals=BH * L * L,
        bytes_accessed=(4 * BH * L * D + BH * L * L) * itemsize,
    )
    ctx3, attn = pl.pallas_call(
        functools.partial(_attention_kernel, scale=scale),
        out_shape=[jax.ShapeDtypeStruct((BH, L, D), dt),
                   jax.ShapeDtypeStruct((BH, L, L), dt)],
        grid_spec=pltpu.PrefetchScalarGridSpec(
            num_scalar_prefetch=0,
            grid=(BH // th,),
            in_specs=[qkv_spec, qkv_spec, qkv_spec],
            out_specs=[qkv_spec,
                       pl.BlockSpec((th, L, L), lambda i: (i, 0, 0))],
        ),
        compiler_params=_COMPILER_PARAMS,
        cost_estimate=attn_cost,
    )(q3, k3, v3)

    # ---- kernel 3: final linear + residual + LayerNorm ------------------------
    ctx2d = ctx3.reshape(N, model_dim)            # == context.view(B, -1, H*D)
    final_cost = pl.CostEstimate(
        flops=2 * N * model_dim * model_dim + 8 * N * model_dim,
        transcendentals=N,
        bytes_accessed=(3 * N * model_dim + model_dim * model_dim) * itemsize,
    )
    out2d = pl.pallas_call(
        _final_kernel,
        out_shape=jax.ShapeDtypeStruct((N, model_dim), dt),
        grid_spec=pltpu.PrefetchScalarGridSpec(
            num_scalar_prefetch=0,
            grid=(N // bn,),
            in_specs=[row_spec, row_spec, w_spec, b_spec, b_spec, b_spec],
            out_specs=row_spec,
        ),
        compiler_params=_COMPILER_PARAMS,
        cost_estimate=final_cost,
    )(ctx2d, q2d, params["wf_t"], params["bf"], params["gamma"], params["beta"])

    return out2d.reshape(B, L, model_dim), attn


# ----------------------------- demo / test ----------------------------------


if __name__ == "__main__":
    B, L = 2, 8
    model_dim, num_heads = 128, 4
    dim_per_head = model_dim // num_heads          # 32

    root = jax.random.PRNGKey(0)
    ks = jax.random.split(root, 11)

    dt = jnp.float32
    key_in = jax.random.normal(ks[0], (B, L, model_dim), dt)
    value_in = jax.random.normal(ks[1], (B, L, model_dim), dt)
    query_in = jax.random.normal(ks[2], (B, L, model_dim), dt)

    bound = 1.0 / (model_dim ** 0.5)

    def _linear_params(kw, kb):
        w = jax.random.uniform(kw, (model_dim, model_dim), dt, -bound, bound)
        b = jax.random.uniform(kb, (model_dim,), dt, -bound, bound)
        return w, b

    wk, bk = _linear_params(ks[3], ks[4])
    wv, bv = _linear_params(ks[5], ks[6])
    wq, bq = _linear_params(ks[7], ks[8])
    wf, bf = _linear_params(ks[9], ks[10])
    gamma = jnp.ones((model_dim,), dt)      # LayerNorm weight
    beta = jnp.zeros((model_dim,), dt)      # LayerNorm bias

    params = prepare_mha_params(wk, bk, wv, bv, wq, bq, wf, bf, gamma, beta,
                                compute_dtype=dt)

    out, attn = multi_head_attention(key_in, value_in, query_in, params,
                                     num_heads=num_heads)
    out = jax.block_until_ready(out)
    attn = jax.block_until_ready(attn)

    # ---- pure-JAX reference replicating the PyTorch forward ------------------
    hp = jax.lax.Precision.HIGHEST
    k_p = jnp.einsum("bld,od->blo", key_in, wk, precision=hp) + bk
    v_p = jnp.einsum("bld,od->blo", value_in, wv, precision=hp) + bv
    q_p = jnp.einsum("bld,od->blo", query_in, wq, precision=hp) + bq
    BH = B * num_heads
    k3 = k_p.reshape(BH, L, dim_per_head)
    v3 = v_p.reshape(BH, L, dim_per_head)
    q3 = q_p.reshape(BH, L, dim_per_head)
    scale = (dim_per_head // num_heads) ** (-0.5)
    scores = jnp.einsum("bqd,bkd->bqk", q3, k3, precision=hp) * scale
    attn_expected = jax.nn.softmax(scores, axis=-1)
    ctx = jnp.einsum("bqk,bkd->bqd", attn_expected, v3, precision=hp)
    ctx2 = ctx.reshape(B, L, model_dim)
    y = jnp.einsum("blf,of->blo", ctx2, wf, precision=hp) + bf
    z = query_in + y
    mu = jnp.mean(z, axis=-1, keepdims=True)
    var = jnp.mean((z - mu) ** 2, axis=-1, keepdims=True)
    out_expected = (z - mu) / jnp.sqrt(var + 1e-5) * gamma + beta

    assert out.shape == (B, L, model_dim)
    assert attn.shape == (BH, L, L)
    assert jnp.max(jnp.abs(attn - attn_expected)) < 2e-3, "attention mismatch vs reference"
    assert jnp.max(jnp.abs(out - out_expected)) < 2e-3, "output mismatch vs reference"

    print("KERNEL_OK")
</pallas_src>

<mosaic_0001>
module attributes {stable_mosaic.version = 11 : i64} {
  func.func @_qkv_proj_kernel(%arg0: i32, %arg1: memref<8x128xf32, #tpu.memory_space<vmem>>, %arg2: memref<8x128xf32, #tpu.memory_space<vmem>>, %arg3: memref<8x128xf32, #tpu.memory_space<vmem>>, %arg4: memref<128x128xf32, #tpu.memory_space<vmem>>, %arg5: memref<1x128xf32, #tpu.memory_space<vmem>>, %arg6: memref<128x128xf32, #tpu.memory_space<vmem>>, %arg7: memref<1x128xf32, #tpu.memory_space<vmem>>, %arg8: memref<128x128xf32, #tpu.memory_space<vmem>>, %arg9: memref<1x128xf32, #tpu.memory_space<vmem>>, %arg10: memref<8x128xf32, #tpu.memory_space<vmem>>, %arg11: memref<8x128xf32, #tpu.memory_space<vmem>>, %arg12: memref<8x128xf32, #tpu.memory_space<vmem>>) attributes {dimension_semantics = [#tpu.dimension_semantics<parallel>], iteration_bounds = array<i64: 2>, scalar_prefetch = 0 : i64, scratch_operands = 0 : i64, tpu.core_type = #tpu.core_type<tc>, window_params = [{transform_indices = @transform_0, window_bounds = array<i64: 8, 128>}, {transform_indices = @transform_1, window_bounds = array<i64: 8, 128>}, {transform_indices = @transform_2, window_bounds = array<i64: 8, 128>}, {pipeline_mode = #tpu.pipeline_mode<synchronous>, transform_indices = @transform_3, window_bounds = array<i64: 128, 128>}, {pipeline_mode = #tpu.pipeline_mode<synchronous>, transform_indices = @transform_4, window_bounds = array<i64: 1, 128>}, {pipeline_mode = #tpu.pipeline_mode<synchronous>, transform_indices = @transform_5, window_bounds = array<i64: 128, 128>}, {pipeline_mode = #tpu.pipeline_mode<synchronous>, transform_indices = @transform_6, window_bounds = array<i64: 1, 128>}, {pipeline_mode = #tpu.pipeline_mode<synchronous>, transform_indices = @transform_7, window_bounds = array<i64: 128, 128>}, {pipeline_mode = #tpu.pipeline_mode<synchronous>, transform_indices = @transform_8, window_bounds = array<i64: 1, 128>}, {transform_indices = @transform_9, window_bounds = array<i64: 8, 128>}, {transform_indices = @transform_10, window_bounds = array<i64: 8, 128>}, {transform_indices = @transform_11, window_bounds = array<i64: 8, 128>}]} {
    %c0 = arith.constant 0 : index
    %c0_0 = arith.constant 0 : index
    %0 = vector.load %arg1[%c0, %c0_0] : memref<8x128xf32, #tpu.memory_space<vmem>>, vector<8x128xf32>
    %c0_1 = arith.constant 0 : index
    %c0_2 = arith.constant 0 : index
    %1 = vector.load %arg4[%c0_1, %c0_2] : memref<128x128xf32, #tpu.memory_space<vmem>>, vector<128x128xf32>
    %cst = arith.constant dense<0.000000e+00> : vector<8x128xf32>
    %2 = tpu.matmul %0, %1, %cst {dimension_numbers = #tpu.dot_dimension_numbers<[1], [0], [0], [1], [0, 0, 1, 1], [], []>} : vector<8x128xf32>, vector<128x128xf32>, vector<8x128xf32> -> vector<8x128xf32>
    %c0_3 = arith.constant 0 : index
    %c0_4 = arith.constant 0 : index
    %3 = vector.load %arg5[%c0_3, %c0_4] : memref<1x128xf32, #tpu.memory_space<vmem>>, vector<1x128xf32>
    %4 = vector.broadcast %3 : vector<1x128xf32> to vector<8x128xf32>
    %5 = arith.addf %2, %4 : vector<8x128xf32>
    %c0_5 = arith.constant 0 : index
    %c0_6 = arith.constant 0 : index
    %6 = vector.load %arg10[%c0_5, %c0_6] : memref<8x128xf32, #tpu.memory_space<vmem>>, vector<8x128xf32>
    tpu.vector_store %arg10[%c0_5, %c0_6], %5 {strides = array<i32>} : memref<8x128xf32, #tpu.memory_space<vmem>>, vector<8x128xf32>,
    %c0_7 = arith.constant 0 : index
    %c0_8 = arith.constant 0 : index
    %7 = vector.load %arg2[%c0_7, %c0_8] : memref<8x128xf32, #tpu.memory_space<vmem>>, vector<8x128xf32>
    %c0_9 = arith.constant 0 : index
    %c0_10 = arith.constant 0 : index
    %8 = vector.load %arg6[%c0_9, %c0_10] : memref<128x128xf32, #tpu.memory_space<vmem>>, vector<128x128xf32>
    %cst_11 = arith.constant dense<0.000000e+00> : vector<8x128xf32>
    %9 = tpu.matmul %7, %8, %cst_11 {dimension_numbers = #tpu.dot_dimension_numbers<[1], [0], [0], [1], [0, 0, 1, 1], [], []>} : vector<8x128xf32>, vector<128x128xf32>, vector<8x128xf32> -> vector<8x128xf32>
    %c0_12 = arith.constant 0 : index
    %c0_13 = arith.constant 0 : index
    %10 = vector.load %arg7[%c0_12, %c0_13] : memref<1x128xf32, #tpu.memory_space<vmem>>, vector<1x128xf32>
    %11 = vector.broadcast %10 : vector<1x128xf32> to vector<8x128xf32>
    %12 = arith.addf %9, %11 : vector<8x128xf32>
    %c0_14 = arith.constant 0 : index
    %c0_15 = arith.constant 0 : index
    %13 = vector.load %arg11[%c0_14, %c0_15] : memref<8x128xf32, #tpu.memory_space<vmem>>, vector<8x128xf32>
    tpu.vector_store %arg11[%c0_14, %c0_15], %12 {strides = array<i32>} : memref<8x128xf32, #tpu.memory_space<vmem>>, vector<8x128xf32>,
    %c0_16 = arith.constant 0 : index
    %c0_17 = arith.constant 0 : index
    %14 = vector.load %arg3[%c0_16, %c0_17] : memref<8x128xf32, #tpu.memory_space<vmem>>, vector<8x128xf32>
    %c0_18 = arith.constant 0 : index
    %c0_19 = arith.constant 0 : index
    %15 = vector.load %arg8[%c0_18, %c0_19] : memref<128x128xf32, #tpu.memory_space<vmem>>, vector<128x128xf32>
    %cst_20 = arith.constant dense<0.000000e+00> : vector<8x128xf32>
    %16 = tpu.matmul %14, %15, %cst_20 {dimension_numbers = #tpu.dot_dimension_numbers<[1], [0], [0], [1], [0, 0, 1, 1], [], []>} : vector<8x128xf32>, vector<128x128xf32>, vector<8x128xf32> -> vector<8x128xf32>
    %c0_21 = arith.constant 0 : index
    %c0_22 = arith.constant 0 : index
    %17 = vector.load %arg9[%c0_21, %c0_22] : memref<1x128xf32, #tpu.memory_space<vmem>>, vector<1x128xf32>
    %18 = vector.broadcast %17 : vector<1x128xf32> to vector<8x128xf32>
    %19 = arith.addf %16, %18 : vector<8x128xf32>
    %c0_23 = arith.constant 0 : index
    %c0_24 = arith.constant 0 : index
    %20 = vector.load %arg12[%c0_23, %c0_24] : memref<8x128xf32, #tpu.memory_space<vmem>>, vector<8x128xf32>
    tpu.vector_store %arg12[%c0_23, %c0_24], %19 {strides = array<i32>} : memref<8x128xf32, #tpu.memory_space<vmem>>, vector<8x128xf32>,
    return
  }
  func.func @transform_0(%arg0: i32) -> (i32, i32) {
    %c0_i32 = arith.constant 0 : i32
    %c0_i32_0 = arith.constant 0 : i32
    return %arg0, %c0_i32 : i32, i32
  }
  func.func @transform_1(%arg0: i32) -> (i32, i32) {
    %c0_i32 = arith.constant 0 : i32
    %c0_i32_0 = arith.constant 0 : i32
    return %arg0, %c0_i32 : i32, i32
  }
  func.func @transform_2(%arg0: i32) -> (i32, i32) {
    %c0_i32 = arith.constant 0 : i32
    %c0_i32_0 = arith.constant 0 : i32
    return %arg0, %c0_i32 : i32, i32
  }
  func.func @transform_3(%arg0: i32) -> (i32, i32) {
    %c0_i32 = arith.constant 0 : i32
    %c0_i32_0 = arith.constant 0 : i32
    %c0_i32_1 = arith.constant 0 : i32
    return %c0_i32, %c0_i32_0 : i32, i32
  }
  func.func @transform_4(%arg0: i32) -> (i32, i32) {
    %c0_i32 = arith.constant 0 : i32
    %c0_i32_0 = arith.constant 0 : i32
    %c0_i32_1 = arith.constant 0 : i32
    return %c0_i32, %c0_i32_0 : i32, i32
  }
  func.func @transform_5(%arg0: i32) -> (i32, i32) {
    %c0_i32 = arith.constant 0 : i32
    %c0_i32_0 = arith.constant 0 : i32
    %c0_i32_1 = arith.constant 0 : i32
    return %c0_i32, %c0_i32_0 : i32, i32
  }
  func.func @transform_6(%arg0: i32) -> (i32, i32) {
    %c0_i32 = arith.constant 0 : i32
    %c0_i32_0 = arith.constant 0 : i32
    %c0_i32_1 = arith.constant 0 : i32
    return %c0_i32, %c0_i32_0 : i32, i32
  }
  func.func @transform_7(%arg0: i32) -> (i32, i32) {
    %c0_i32 = arith.constant 0 : i32
    %c0_i32_0 = arith.constant 0 : i32
    %c0_i32_1 = arith.constant 0 : i32
    return %c0_i32, %c0_i32_0 : i32, i32
  }
  func.func @transform_8(%arg0: i32) -> (i32, i32) {
    %c0_i32 = arith.constant 0 : i32
    %c0_i32_0 = arith.constant 0 : i32
    %c0_i32_1 = arith.constant 0 : i32
    return %c0_i32, %c0_i32_0 : i32, i32
  }
  func.func @transform_9(%arg0: i32) -> (i32, i32) {
    %c0_i32 = arith.constant 0 : i32
    %c0_i32_0 = arith.constant 0 : i32
    return %arg0, %c0_i32 : i32, i32
  }
  func.func @transform_10(%arg0: i32) -> (i32, i32) {
    %c0_i32 = arith.constant 0 : i32
    %c0_i32_0 = arith.constant 0 : i32
    return %arg0, %c0_i32 : i32, i32
  }
  func.func @transform_11(%arg0: i32) -> (i32, i32) {
    %c0_i32 = arith.constant 0 : i32
    %c0_i32_0 = arith.constant 0 : i32
    return %arg0, %c0_i32 : i32, i32
  }
}

</mosaic_0001>

<bundles_post_ra>
// kernel: tpu_custom_call.1
= control target key start
LH: loop header
LB: loop body
LE: loop exit
PB: predicated region body
PF: predicated region fallthrough
CT: control target
= control target key end

     0   :  { %s2280_s0 = inlined_call_operand.hbm [shape: f32[16,128], index: 0, kind: input, shape index: {}]   ;;  %s2281_s1 = inlined_call_operand.hbm [shape: f32[16,128], index: 1, kind: input, shape index: {}]   ;;  %s2282_s2 = inlined_call_operand.hbm [shape: f32[16,128], index: 2, kind: input, shape index: {}]   ;;  %s2283_s3 = inlined_call_operand.hbm [shape: f32[128,128], index: 3, kind: input, shape index: {}]   ;;  %s2284_s4 = inlined_call_operand.vmem [shape: f32[1,128], index: 4, kind: input, shape index: {}]   ;;  %s2285_s5 = inlined_call_operand.hbm [shape: f32[128,128], index: 5, kind: input, shape index: {}]   ;;  %s2286_s6 = inlined_call_operand.vmem [shape: f32[1,128], index: 6, kind: input, shape index: {}]   ;;  %s2287_s7 = inlined_call_operand.hbm [shape: f32[128,128], index: 7, kind: input, shape index: {}]   ;;  %s2288_s8 = inlined_call_operand.vmem [shape: f32[1,128], index: 8, kind: input, shape index: {}]   ;;  %s2289_s9 = inlined_call_operand.hbm [shape: f32[16,128], index: 9, kind: output, shape index: {0}]   ;;  %s2290_s10 = inlined_call_operand.hbm [shape: f32[16,128], index: 10, kind: output, shape index: {1}]   ;;  %s2291_s11 = inlined_call_operand.hbm [shape: f32[16,128], index: 11, kind: output, shape index: {2}]  }
   0x1   :  { %2319 = sst [smem:[#allocation28_spill]] %s2281_s1 }
   0x2   :  { %2320 = sst [smem:[#allocation29_spill]] %s2283_s3 }
   0x3   :  { %2321 = sst [smem:[#allocation30_spill]] %s2286_s6 }
   0x4   :  { %2322 = sst [smem:[#allocation31_spill]] %s2288_s8 }
   0x5   :  { %2323 = sst [smem:[#allocation32_spill]] %s2289_s9 }
   0x6   :  { %2324 = sst [smem:[#allocation33_spill]] %s2290_s10 }
   0x7   :  { %2325 = sst [smem:[#allocation34_spill]] %s2291_s11 }
   0x8   :  { %17 = vsyncpa [#allocation3], 0 }
   0x9   :  { %19 = vsyncpa [#allocation3 + $0x1], 0 }
   0xa   :  { %20 = vsyncpa [#allocation6], 0 }
   0xb   :  { %22 = vsyncpa [#allocation6 + $0x1], 0 }
   0xc   :  { %23 = vsyncpa [#allocation9], 0 }
   0xd   :  { %24 = vsyncpa [#allocation12], 0 }
   0xe   :  { %25 = vsyncpa [#allocation4], 0 }
   0xf   :  { %27 = vsyncpa [#allocation4 + $0x1], 0 }
  0x10   :  { %28 = vsyncpa [#allocation15], 0 }
  0x11   :  { %30 = vsyncpa [#allocation15 + $0x1], 0  ;;  %s1824_s17 = smov 0   ;;  %s1826_s18 = smov 0  }
  0x12   :  { %s1828_s19 = smov 0   ;;  %s1830_s20 = smov 0  }
  0x13 LB: > { %2326 = sst [smem:[#allocation23_spill]] %s1736_s17  ;;  %s1845_s21 = sadd.s32 4294967295, %s1748_s20   ;;  %s1748_s20 = sphi %s1830_s20, %s2369_s20   ;;  %s1744_s19 = sphi %s1828_s19, %s2373_s19   ;;  %s1740_s18 = sphi %s1826_s18, %s2372_s18   ;;  %s1736_s17 = sphi %s1824_s17, %s2371_s17  }
  0x14   : > { %2327 = sst [smem:[#allocation24_spill]] %s1748_s20  ;;  %s2292_s22 = sadd.s32 4294967294, %s1748_s20  }
  0x15   : > { %p56_p0 = scmp.ne.s32.totalorder %s1740_s18, %s1736_s17  ;;  %p2295_p1 = scmp.eq.s32.totalorder %s1845_s21, 0 }
  0x16   : > { %p264_p3 = scmp.eq.s32.totalorder %s2292_s22, 1  ;;  %p1074_p5 = scmp.ge.s32.totalorder %s1748_s20, 1 }
  0x17   : > { %p1856_p4 = por %p2295_p1, %p56_p0  ;;  %p323_p7 = scmp.lt.s32.totalorder %s1748_s20, 3 }
  0x18   : > { %p1861_p6 = por %p264_p3, %p56_p0  ;;  %s1750_s26 = smov [#allocation8]  }
  0x19   : > { %s2328_s23 = scalar_select %p1856_p4, 1, 0 }
  0x1a   : > { %s2329_s24 = scalar_select %p1861_p6, 1, 0 }
  0x1b   : > { %p1866_p8 = pnand %p1074_p5, %p323_p7  ;;  %s335_s27 = sshll.u32 %s1750_s26, 4  ;;  %s1870_s27 = int_to_ptr.vmem [resolvable:$true] %s335_s27 }
  0x1c   : > { %2330 = sst [smem:[#allocation25_spill]] %s2329_s24  ;;  %s1882_s29 = sadd.s32 1, %s1748_s20  }
  0x1d   : > { %s2331_s25 = scalar_select %p1866_p8, 1, 0 }
  0x1e   : > { %p1358_p9 = pneg %p1866_p8  ;;  %2333 = sst [smem:[#allocation26_spill]] %s1882_s29 }
  0x1f   : > { %s43_s30 = sadd.s32 1, %s1744_s19  ;;  %s40_s12 = ssub.s32 %s1748_s20, %s1882_s29 }
  0x20   : > { %p1877_p11 = pnand %p1358_p9, %p2295_p1  ;;  %s2334_s3 = sld [smem:[#allocation29_spill]] }
  0x22   : > { %s2332_s28 = scalar_select %p1877_p11, 1, 0 }
  0x23   : > { %p1895_p13 = pneg %p1877_p11 }
  0x25   : > { %s2335_s22 = scalar_select %p1895_p13, 1, 0 }
  0x26   : > { %s1436_s15 = scalar_lea.hbm %s2334_s3, 2048 }
  0x27   : > { %p1437_p12 = scmp.ne.s32.totalorder %s2334_s3, %s1436_s15  ;;  %p1443_p5 = scmp.lt.u32.totalorder %s1436_s15, %s2334_s3 }
  0x29   : > { %p1439_p0 = pnand %p1895_p13, %p1437_p12 }
  0x2b   : > { %p1440_p3 = pneg %p1439_p0 }
  0x2d   : > { %p1445_p7 = pnand %p1443_p5, %p1440_p3 }
  0x2f   : > { %1448 = shalt.err (!%p1445_p7)
}
  0x30   : > { %s1449_s13 = scalar_lea.vmem %s1870_s27, 2048  ;;  %p1457_p2 = scmp.lt.s32.totalorder %s1870_s27, %s1870_s27 }
  0x31   : > { %p1450_p9 = scmp.ne.s32.totalorder %s1870_s27, %s1449_s13  ;;  %p1458_p6 = scmp.lt.s32.totalorder %s1449_s13, %s1449_s13 }
  0x33   : > { %p1452_p10 = pnand %p1450_p9, %p1895_p13  ;;  %p1459_p12 = por %p1458_p6, %p1457_p2 }
  0x35   : > { %p1453_p1 = pneg %p1452_p10 }
  0x37   : > { %p1460_p0 = pnand %p1459_p12, %p1453_p1 }
  0x39   : > { %1463 = shalt.err (!%p1460_p0)
}
  0x3a   : > { %s2299_s14 = smov 128   ;;  %s2301_s17 = smov 8  }
  0x3b   : > { %1361 = dma.hbm_to_vmem [thread:$0]  (!%p1877_p11), %s2334_s3, 2048, %s1870_s27, [#allocation9], %s2299_s14, %s2299_s14, %s2301_s17  }
  0x3c   : > { %p41_p1 = scmp.eq.s32.totalorder %s40_s12, 0  ;;  %p50_p2 = scmp.ne.s32.totalorder %s1744_s19, %s1740_s18 }
  0x3d   : > { %p51_p6 = scmp.eq.s32.totalorder %s1748_s20, 0  ;;  %p1391_p10 = scmp.lt.s32.totalorder %s1748_s20, 2 }
  0x3e   : > { %s1924_s16 = scalar_select %p41_p1, %s1744_s19, %s43_s30  }
  0x3f   : > { %p52_p3 = por %p51_p6, %p50_p2  ;;  %p2337_p5 = scmp.eq.s32.totalorder %s1845_s21, 1 }
  0x40   : > { %2336 = sst [smem:[#allocation27_spill]] %s1924_s16  ;;  %s2303_s13 = sand.u32 1, %s1744_s19  }
  0x41   : > { %p1928_p7 = por %p2337_p5, %p50_p2  ;;  %s1934_s29 = sshll.u32 %s1748_s20, 7 }
  0x42   : > { %s1938_s11 = sshll.u32 %s2303_s13, 3  ;;  %p1940_p9 = pnand %p1391_p10, %p52_p3 }
  0x43   : > { %s2338_s26 = scalar_select %p1928_p7, 1, 0 }
  0x44   : > { %s2339_s27 = scalar_select %p1940_p9, 1, 0 }
  0x45   : > { %s402_s30 = sand.u32 1, %s1748_s20   ;;  %s2340_s1 = sld [smem:[#allocation28_spill]] }
  0x46   : > { %s406_s14 = scalar_lea.vmem [#allocation5], %s1938_s11  ;;  %s1954_s13 = scalar_lea.sflag [#allocation6], %s402_s30 }
  0x47   : > { %s413_s17 = sshll.u32 %s406_s14, 4  ;;  %p1960_p0 = pneg %p1940_p9  ;;  %s1952_s17 = int_to_ptr.vmem [resolvable:$true] %s413_s17 }
  0x49   : > { %s2341_s16 = scalar_select %p1960_p0, 1, 0 }
  0x4b   : > { %s1949_s15 = scalar_lea.hbm %s2340_s1, %s1934_s29  ;;  %s1469_s20 = scalar_lea.hbm %s2340_s1, 256 }
  0x4c   : > { %s1464_s3 = scalar_lea.hbm %s1949_s15, 128  ;;  %p1470_p6 = scmp.lt.u32.totalorder %s1949_s15, %s2340_s1 }
  0x4d   : > { %p1465_p12 = scmp.ne.s32.totalorder %s1949_s15, %s1464_s3  ;;  %p1471_p10 = scmp.lt.u32.totalorder %s1469_s20, %s1464_s3 }
  0x4e   : > { %p1473_p5 = scmp.lt.u32.totalorder %s1464_s3, %s1949_s15 }
  0x4f   : > { %p1467_p1 = pnand %p1960_p0, %p1465_p12  ;;  %p1472_p3 = por %p1471_p10, %p1470_p6 }
  0x51   : > { %p1468_p2 = pneg %p1467_p1  ;;  %p1474_p7 = por %p1473_p5, %p1472_p3 }
  0x53   : > { %p1475_p4 = pnand %p1474_p7, %p1468_p2 }
  0x55   : > { %1478 = shalt.err (!%p1475_p4)
}
  0x56   : > { %s1479_s30 = scalar_lea.vmem %s1952_s17, 128  ;;  %s1753_s12 = smov [#allocation5]  }
  0x57   : > { %p1480_p12 = scmp.ne.s32.totalorder %s1952_s17, %s1479_s30  ;;  %s1484_s24 = sshll.u32 %s1753_s12, 4  ;;  %s1485_s24 = int_to_ptr.vmem [resolvable:$false] %s1484_s24 }
  0x58   : > { %s1486_s8 = scalar_lea.vmem %s1485_s24, 256  ;;  %p1487_p11 = scmp.lt.s32.totalorder %s1952_s17, %s1485_s24 }
  0x59   : > { %p1482_p1 = pnand %p1480_p12, %p1960_p0  ;;  %p1488_p13 = scmp.lt.s32.totalorder %s1486_s8, %s1479_s30 }
  0x5b   : > { %p1483_p8 = pneg %p1482_p1  ;;  %p1489_p6 = por %p1488_p13, %p1487_p11 }
  0x5d   : > { %p1490_p10 = pnand %p1489_p6, %p1483_p8 }
  0x5f   : > { %1493 = shalt.err (!%p1490_p10)
}
  0x60   : > { %1374 = dma.hbm_to_vmem [thread:$0]  (!%p1940_p9), %s1949_s15, 128, %s1952_s17, %s1954_s13  }
  0x61   : > { %s1754_s3 = smov [#allocation10]   ;;  %s1755_s14 = smov [#allocation11]  }
  0x62   : > { %s351_s20 = sshll.u32 %s1754_s3, 4  ;;  %s367_s1 = sshll.u32 %s1755_s14, 4  ;;  %s352_s20 = int_to_ptr.vmem [resolvable:$true] %s351_s20  ;;  %s368_s1 = int_to_ptr.vmem [resolvable:$true] %s367_s1 }
  0x63   : > { %s1494_s24 = scalar_lea.hbm %s2285_s5, 2048  ;;  %p2342_p8 = scmp.ne.s32.totalorder %s2335_s22, 0 }
  0x64   : > { %p1495_p4 = scmp.ne.s32.totalorder %s2285_s5, %s1494_s24  ;;  %p1501_p7 = scmp.lt.u32.totalorder %s1494_s24, %s2285_s5 }
  0x66   : > { %p1497_p11 = pnand %p1495_p4, %p2342_p8 }
  0x68   : > { %p1498_p13 = pneg %p1497_p11 }
  0x6a   : > { %p1503_p2 = pnand %p1501_p7, %p1498_p13 }
  0x6c   : > { %1506 = shalt.err (!%p1503_p2)
}
  0x6d   : > { %s1507_s17 = scalar_lea.vmem %s352_s20, 2048  ;;  %p1515_p1 = scmp.lt.s32.totalorder %s352_s20, %s352_s20 }
  0x6e   : > { %p1508_p3 = scmp.ne.s32.totalorder %s352_s20, %s1507_s17  ;;  %p1516_p6 = scmp.lt.s32.totalorder %s1507_s17, %s1507_s17 }
  0x70   : > { %p1510_p5 = pnand %p1508_p3, %p2342_p8  ;;  %p1517_p10 = por %p1516_p6, %p1515_p1 }
  0x72   : > { %p1511_p12 = pneg %p1510_p5 }
  0x74   : > { %p1518_p9 = pnand %p1517_p10, %p1511_p12 }
  0x76   : > { %1521 = shalt.err (!%p1518_p9)
}
  0x77   : > { %p2343_p4 = scmp.ne.s32.totalorder %s2332_s28, 0  ;;  %s2344_s10 = smov 8  }
  0x78   : > { %s2345_s15 = smov 128   ;;  %s1522_s12 = scalar_lea.hbm %s2287_s7, 2048 }
  0x79   : > { %1364 = dma.hbm_to_vmem [thread:$0]  (!%p2343_p4), %s2285_s5, 2048, %s352_s20, [#allocation9], %s2345_s15, %s2345_s15, %s2344_s10  }
  0x7a   : > { %p1523_p11 = scmp.ne.s32.totalorder %s2287_s7, %s1522_s12  ;;  %p1529_p7 = scmp.lt.u32.totalorder %s1522_s12, %s2287_s7 }
  0x7c   : > { %p1525_p9 = pnand %p1523_p11, %p2342_p8 }
  0x7e   : > { %p1526_p13 = pneg %p1525_p9 }
  0x80   : > { %p1531_p2 = pnand %p1529_p7, %p1526_p13 }
  0x82   : > { %1534 = shalt.err (!%p1531_p2)
}
  0x83   : > { %s1535_s6 = scalar_lea.vmem %s368_s1, 2048  ;;  %p1543_p1 = scmp.lt.s32.totalorder %s368_s1, %s368_s1 }
  0x84   : > { %p1536_p3 = scmp.ne.s32.totalorder %s368_s1, %s1535_s6  ;;  %p1544_p6 = scmp.lt.s32.totalorder %s1535_s6, %s1535_s6 }
  0x86   : > { %p1538_p5 = pnand %p1536_p3, %p2342_p8  ;;  %p1545_p10 = por %p1544_p6, %p1543_p1 }
  0x88   : > { %p1539_p12 = pneg %p1538_p5 }
  0x8a   : > { %p1546_p0 = pnand %p1545_p10, %p1539_p12 }
  0x8c   : > { %1549 = shalt.err (!%p1546_p0)
}
  0x8d   : > { %1367 = dma.hbm_to_vmem [thread:$0]  (!%p2343_p4), %s2287_s7, 2048, %s368_s1, [#allocation12], %s2345_s15, %s2345_s15, %s2344_s10  }
  0x8e   : > { %s2030_s14 = scalar_lea.hbm %s2280_s0, %s1934_s29  ;;  %s388_s28 = scalar_lea.vmem [#allocation2], %s1938_s11 }
  0x8f   : > { %s395_s12 = sshll.u32 %s388_s28, 4  ;;  %s2039_s8 = scalar_lea.hbm %s2282_s2, %s1934_s29  ;;  %s2033_s12 = int_to_ptr.vmem [resolvable:$true] %s395_s12 }
  0x90   : > { %s2346_s17 = sand.u32 1, %s1744_s19   ;;  %s1550_s10 = scalar_lea.hbm %s2030_s14, 128 }
  0x91   : > { %s385_s1 = scalar_lea.sflag [#allocation3], %s2346_s17  ;;  %p1551_p0 = scmp.ne.s32.totalorder %s2030_s14, %s1550_s10 }
  0x92   : > { %p2347_p8 = scmp.ne.s32.totalorder %s2341_s16, 0  ;;  %s1555_s20 = scalar_lea.hbm %s2280_s0, 256 }
  0x93   : > { %p1556_p9 = scmp.lt.u32.totalorder %s2030_s14, %s2280_s0  ;;  %p1557_p13 = scmp.lt.u32.totalorder %s1555_s20, %s1550_s10 }
  0x94   : > { %p1553_p4 = pnand %p1551_p0, %p2347_p8  ;;  %p1559_p2 = scmp.lt.u32.totalorder %s1550_s10, %s2030_s14 }
  0x95   : > { %p1558_p7 = por %p1557_p13, %p1556_p9 }
  0x96   : > { %p1554_p11 = pneg %p1553_p4 }
  0x97   : > { %p1560_p3 = por %p1559_p2, %p1558_p7 }
  0x99   : > { %p1561_p5 = pnand %p1560_p3, %p1554_p11 }
  0x9b   : > { %1564 = shalt.err (!%p1561_p5)
}
  0x9c   : > { %s1565_s29 = scalar_lea.vmem %s2033_s12, 128  ;;  %s1756_s3 = smov [#allocation2]  }
  0x9d   : > { %p1566_p12 = scmp.ne.s32.totalorder %s2033_s12, %s1565_s29  ;;  %s1570_s28 = sshll.u32 %s1756_s3, 4  ;;  %s1571_s28 = int_to_ptr.vmem [resolvable:$false] %s1570_s28 }
  0x9e   : > { %s1572_s24 = scalar_lea.vmem %s1571_s28, 256  ;;  %p1573_p10 = scmp.lt.s32.totalorder %s2033_s12, %s1571_s28 }
  0x9f   : > { %p1568_p1 = pnand %p1566_p12, %p2347_p8  ;;  %p1574_p0 = scmp.lt.s32.totalorder %s1572_s24, %s1565_s29 }
  0xa1   : > { %p1569_p6 = pneg %p1568_p1  ;;  %p1575_p4 = por %p1574_p0, %p1573_p10 }
  0xa3   : > { %p1576_p9 = pnand %p1575_p4, %p1569_p6 }
  0xa5   : > { %1579 = shalt.err (!%p1576_p9)
}
  0xa6   : > { %p2348_p11 = scmp.ne.s32.totalorder %s2339_s27, 0  ;;  %s424_s30 = scalar_lea.vmem [#allocation7], %s1938_s11 }
  0xa7   : > { %s431_s17 = sshll.u32 %s424_s30, 4  ;;  %s1580_s10 = scalar_lea.hbm %s2039_s8, 128  ;;  %s432_s17 = int_to_ptr.vmem [resolvable:$true] %s431_s17 }
  0xa8   : > { %1371 = dma.hbm_to_vmem [thread:$0]  (!%p2348_p11), %s2030_s14, 128, %s2033_s12, %s385_s1  }
  0xa9   : > { %p1581_p13 = scmp.ne.s32.totalorder %s2039_s8, %s1580_s10  ;;  %s1585_s20 = scalar_lea.hbm %s2282_s2, 256 }
  0xaa   : > { %p1586_p3 = scmp.lt.u32.totalorder %s2039_s8, %s2282_s2  ;;  %p1587_p5 = scmp.lt.u32.totalorder %s1585_s20, %s1580_s10 }
  0xab   : > { %p1583_p7 = pnand %p1581_p13, %p2347_p8  ;;  %p1589_p1 = scmp.lt.u32.totalorder %s1580_s10, %s2039_s8 }
  0xac   : > { %p1588_p12 = por %p1587_p5, %p1586_p3 }
  0xad   : > { %p1584_p2 = pneg %p1583_p7 }
  0xae   : > { %p1590_p6 = por %p1589_p1, %p1588_p12 }
  0xb0   : > { %p1591_p10 = pnand %p1590_p6, %p1584_p2 }
  0xb2   : > { %1594 = shalt.err (!%p1591_p10)
}
  0xb3   : > { %s1595_s11 = scalar_lea.vmem %s432_s17, 128  ;;  %s1757_s14 = smov [#allocation7]  }
  0xb4   : > { %p1596_p0 = scmp.ne.s32.totalorder %s432_s17, %s1595_s11  ;;  %s1600_s12 = sshll.u32 %s1757_s14, 4  ;;  %s1601_s12 = int_to_ptr.vmem [resolvable:$false] %s1600_s12 }
  0xb5   : > { %s1602_s1 = scalar_lea.vmem %s1601_s12, 256  ;;  %p1603_p13 = scmp.lt.s32.totalorder %s432_s17, %s1601_s12 }
  0xb6   : > { %p1598_p4 = pnand %p1596_p0, %p2347_p8  ;;  %p1604_p7 = scmp.lt.s32.totalorder %s1602_s1, %s1595_s11 }
  0xb8   : > { %p1599_p9 = pneg %p1598_p4  ;;  %p1605_p11 = por %p1604_p7, %p1603_p13 }
  0xba   : > { %p1606_p3 = pnand %p1605_p11, %p1599_p9 }
  0xbc   : > { %1609 = shalt.err (!%p1606_p3)
}
  0xbd   : > { %p2349_p5 = scmp.ne.s32.totalorder %s2339_s27, 0  ;;  %p2350_p2 = scmp.ne.s32.totalorder %s2331_s25, 0 }
  0xbe   : > { %s2086_s16 = sand.u32 (!%p2350_p2), 1, %s1740_s18   ;;  %p2351_p8 = scmp.ne.s32.totalorder (!%p2350_p2), %s2328_s23, 0 }
  0xbf   : > { %1377 = dma.hbm_to_vmem [thread:$0]  (!%p2349_p5), %s2039_s8, 128, %s432_s17, %s1954_s13  }
  0xc0   : > { %440 = sbr.rel (%p2350_p2) target bundleno = 520 (0x208), region = 56  ;;  %s2089_s29 = sshll.u32 (!%p2350_p2), %s2086_s16, 3 }
  0xc1   : > { %s443_s3 = scalar_lea.sflag (!%p2350_p2), [#allocation3], %s2086_s16  ;;  %s446_s28 = scalar_lea.vmem (!%p2350_p2), [#allocation2], %s2089_s29 }
  0xc7   : > { %1711 = dma.done.wait (%p2351_p8), %s443_s3, 128  }
  0xc8   : > { %1713 = vsyncadd (%p2351_p8), %s443_s3, 4294967168  ;;  %s451_s25 = sand.u32 1, %s1845_s21   ;;  %s455_s27 = scalar_lea.vmem [#allocation5], %s2089_s29 }
  0xc9   : > { %s452_s13 = scalar_lea.sflag [#allocation6], %s451_s25 }
  0xca   : > { %1715 = dma.done.wait (%p2351_p8), %s452_s13, 256  }
  0xcb   : > { %1717 = vsyncadd (%p2351_p8), %s452_s13, 4294967040  ;;  %s464_s8 = scalar_lea.vmem [#allocation7], %s2089_s29  ;;  %p2352_p11 = scmp.eq.s32.totalorder %s1845_s21, 0 }
  0xcd   : > { %1719 = dma.done.wait (%p2352_p11), [#allocation9], 4096   ;;  %p2353_p12 = pmov %p2352_p11 }
  0xce   : > { %p2354_p1 = pmov %p2352_p11 }
  0xcf   : > { %1721 = vsyncadd (%p2353_p12), [#allocation9], 4294963200 }
  0xd0   : > { %1723 = dma.done.wait (%p2354_p1), [#allocation12], 2048   ;;  %p2355_p6 = pmov %p2354_p1 }
  0xd1   : > { %v1758_v0 = vmov 0.0|0.0   ;;  %vm1759_vm0 = vmmov 0   ;;  %v1760_v1 = vmov 0.0   ;;  %v536_v2 = vld [vmem:[#allocation8] sm:$0xff]  ;;  %v537_v3 = vld [vmem:[#allocation8 + $0x8] sm:$0xff]  ;;  %v538_v4 = vld [vmem:[#allocation8 + $0x10] sm:$0xff] }
  0xd2   : > { %1725 = vsyncadd (%p2355_p6), [#allocation12], 4294965248  ;;  %1262 = vmatprep.subr.bf16.mxu0 %v1758_v0  ;;  %1286 = vmatprep.subr.bf16.mxu1 %v1758_v0  ;;  %v1263_v5 = vpack.c.bf16 %v537_v3, %v536_v2  ;;  %v539_v6 = vld [vmem:[#allocation8 + $0x18] sm:$0xff]  ;;  %v540_v8 = vld [vmem:[#allocation8 + $0x20] sm:$0xff]  ;;  %s2154_s30 = sshll.u32 %s1845_s21, 7  ;;  %s520_s17 = scalar_lea.vmem [#allocation13], %s2089_s29 }
  0xd3   : > { %1189 = vmatprep.mubr.msk.f32.mxu0 %vm1759_vm0, %v1760_v1  ;;  %1224 = vmatprep.mubr.msk.f32.mxu1 %vm1759_vm0, %v1760_v1  ;;  %v1266_v7 = vpack.c.bf16 %v539_v6, %v538_v4  ;;  %v541_v9 = vld [vmem:[#allocation8 + $0x28] sm:$0xff]  ;;  %v631_v10 = vld [vmem:[#allocation10] sm:$0xff]  ;;  %v633_v14 = vld [vmem:[#allocation10 + $0x10] sm:$0xff]  ;;  %s844_s10 = sshll.u32 %s520_s17, 4  ;;  %s2356_s20 = sld [smem:[#allocation32_spill]]  ;;  %s2163_s10 = int_to_ptr.vmem [resolvable:$true] %s844_s10 }
  0xd4   : > { %1264 = vmatpush3.bf16.msra.mxu0 %v1263_v5  ;;  %v632_v11 = vld [vmem:[#allocation10 + $0x8] sm:$0xff]  ;;  %v1269_v13 = vpack.c.bf16 %v541_v9, %v540_v8  ;;  %v634_v15 = vld [vmem:[#allocation10 + $0x18] sm:$0xff]  ;;  %v542_v16 = vld [vmem:[#allocation8 + $0x30] sm:$0xff]  ;;  %s2358_s12 = sld [smem:[#allocation30_spill]]  ;;  %s527_s1 = scalar_lea.vmem [#allocation14], %s2089_s29 }
  0xd5   : > { %1265 = vmatprep.subr.bf16.mxu0 %v1758_v0  ;;  %v1287_v12 = vpack.c.bf16 %v632_v11, %v631_v10  ;;  %v543_v17 = vld [vmem:[#allocation8 + $0x38] sm:$0xff]  ;;  %v1290_v18 = vpack.c.bf16 %v634_v15, %v633_v14  ;;  %v635_v19 = vld [vmem:[#allocation10 + $0x20] sm:$0xff]  ;;  %v636_v20 = vld [vmem:[#allocation10 + $0x28] sm:$0xff]  ;;  %s2171_s3 = sshll.u32 %s527_s1, 4  ;;  %s1610_s13 = scalar_lea.vmem %s2163_s10, 128  ;;  %s2202_s3 = int_to_ptr.vmem [resolvable:$true] %s2171_s3 }
  0xd6   : > { %v1272_v21 = vpack.c.bf16 %v543_v17, %v542_v16  ;;  %v544_v22 = vld [vmem:[#allocation8 + $0x40] sm:$0xff]  ;;  %v545_v23 = vld [vmem:[#allocation8 + $0x48] sm:$0xff]  ;;  %v1293_v24 = vpack.c.bf16 %v636_v20, %v635_v19  ;;  %v637_v25 = vld [vmem:[#allocation10 + $0x30] sm:$0xff]  ;;  %p1611_p10 = scmp.ne.s32.totalorder %s2163_s10, %s1610_s13  ;;  %p2359_p0 = scmp.ne.s32.totalorder %s2338_s26, 0 }
  0xd7   : > { %1288 = vmatpush3.bf16.msra.mxu1 %v1287_v12  ;;  %v638_v26 = vld [vmem:[#allocation10 + $0x38] sm:$0xff]  ;;  %v1275_v27 = vpack.c.bf16 %v545_v23, %v544_v22  ;;  %v546_v28 = vld [vmem:[#allocation8 + $0x50] sm:$0xff]  ;;  %v639_v31 = vld [vmem:[#allocation10 + $0x40] sm:$0xff] }
  0xd8   : > { %1267 = vmatpush3.bf16.msra.mxu0 %v1266_v7  ;;  %1289 = vmatprep.subr.bf16.mxu1 %v1758_v0  ;;  %v547_v29 = vld [vmem:[#allocation8 + $0x58] sm:$0xff]  ;;  %v1296_v30 = vpack.c.bf16 %v638_v26, %v637_v25  ;;  %v640_v32 = vld [vmem:[#allocation10 + $0x48] sm:$0xff]  ;;  %v548_v34 = vld [vmem:[#allocation8 + $0x60] sm:$0xff]  ;;  %p1612_p4 = pnand %p1611_p10, %p2359_p0 }
  0xd9   : > { %1268 = vmatprep.subr.bf16.mxu0 %v1758_v0  ;;  %v1278_v33 = vpack.c.bf16 %v547_v29, %v546_v28  ;;  %v549_v35 = vld [vmem:[#allocation8 + $0x68] sm:$0xff]  ;;  %v1299_v36 = vpack.c.bf16 %v640_v32, %v639_v31  ;;  %v641_v37 = vld [vmem:[#allocation10 + $0x50] sm:$0xff]  ;;  %v642_v38 = vld [vmem:[#allocation10 + $0x58] sm:$0xff]  ;;  %s2357_s9 = smov %s2356_s20  ;;  %s2161_s22 = scalar_lea.hbm %s2356_s20, %s2154_s30 }
  0xda   : > { %v1281_v39 = vpack.c.bf16 %v549_v35, %v548_v34  ;;  %v550_v40 = vld [vmem:[#allocation8 + $0x70] sm:$0xff]  ;;  %v551_v41 = vld [vmem:[#allocation8 + $0x78] sm:$0xff]  ;;  %v1302_v42 = vpack.c.bf16 %v642_v38, %v641_v37  ;;  %v643_v43 = vld [vmem:[#allocation10 + $0x60] sm:$0xff]  ;;  %p1613_p9 = pneg %p1612_p4 }
  0xdb   : > { %1291 = vmatpush3.bf16.msra.mxu1 %v1290_v18  ;;  %v644_v44 = vld [vmem:[#allocation10 + $0x68] sm:$0xff]  ;;  %v1284_v45 = vpack.c.bf16 %v551_v41, %v550_v40  ;;  %v726_v46 = vld [vmem:[#allocation11] sm:$0xff]  ;;  %v645_v49 = vld [vmem:[#allocation10 + $0x70] sm:$0xff] }
  0xdc   : > { %1270 = vmatpush3.bf16.msra.mxu0 %v1269_v13  ;;  %1292 = vmatprep.subr.bf16.mxu1 %v1758_v0  ;;  %v727_v47 = vld [vmem:[#allocation11 + $0x8] sm:$0xff]  ;;  %v1305_v48 = vpack.c.bf16 %v644_v44, %v643_v43  ;;  %v646_v50 = vld [vmem:[#allocation10 + $0x78] sm:$0xff]  ;;  %v728_v53 = vld [vmem:[#allocation11 + $0x10] sm:$0xff] }
  0xdd   : > { %1271 = vmatprep.subr.bf16.mxu0 %v1758_v0  ;;  %v535_v51 = vld [vmem:[%s446_s28] sm:$0xff]  ;;  %v1311_v52 = vpack.c.bf16 %v727_v47, %v726_v46  ;;  %v1308_v55 = vpack.c.bf16 %v646_v50, %v645_v49  ;;  %v730_v57 = vld [vmem:[#allocation11 + $0x20] sm:$0xff]  ;;  %v731_v58 = vld [vmem:[#allocation11 + $0x28] sm:$0xff]  ;;  %s821_s28 = scalar_lea.sflag [#allocation4], %s2086_s16 }
  0xde   : > { %v729_v54 = vld [vmem:[#allocation11 + $0x18] sm:$0xff]  ;;  %v630_v59 = vld [vmem:[%s455_s27] sm:$0xff]  ;;  %v1317_v60 = vpack.c.bf16 %v731_v58, %v730_v57  ;;  %v732_v61 = vld [vmem:[#allocation11 + $0x30] sm:$0xff]  ;;  %s1761_s27 = smov [#allocation13]  }
  0xdf   : > { %1294 = vmatpush3.bf16.msra.mxu1 %v1293_v24  ;;  %v1314_v56 = vpack.c.bf16 %v729_v54, %v728_v53  ;;  %v733_v62 = vld [vmem:[#allocation11 + $0x38] sm:$0xff]  ;;  %v734_v2 = vld [vmem:[#allocation11 + $0x40] sm:$0xff]  ;;  %v736_v4 = vld [vmem:[#allocation11 + $0x50] sm:$0xff] }
  0xe0   : > { %1273 = vmatpush3.bf16.msra.mxu0 %v1272_v21  ;;  %1295 = vmatprep.subr.bf16.mxu1 %v1758_v0  ;;  %v1320_v63 = vpack.c.bf16 %v733_v62, %v732_v61  ;;  %v737_v5 = vld [vmem:[#allocation11 + $0x58] sm:$0xff]  ;;  %v738_v7 = vld [vmem:[#allocation11 + $0x60] sm:$0xff]  ;;  %v739_v8 = vld [vmem:[#allocation11 + $0x68] sm:$0xff] }
  0xe1   : > { %1274 = vmatprep.subr.bf16.mxu0 %v1758_v0  ;;  %v1326_v6 = vpack.c.bf16 %v737_v5, %v736_v4  ;;  %v1329_v9 = vpack.c.bf16 %v739_v8, %v738_v7  ;;  %v740_v10 = vld [vmem:[#allocation11 + $0x70] sm:$0xff]  ;;  %v741_v11 = vld [vmem:[#allocation11 + $0x78] sm:$0xff] }
  0xe2   : > { %v1332_v12 = vpack.c.bf16 %v741_v11, %v740_v10  ;;  %v725_v13 = vld [vmem:[%s464_s8] sm:$0xff]  ;;  %s1614_s8 = sshll.u32 %s1761_s27, 4  ;;  %s1615_s8 = int_to_ptr.vmem [resolvable:$false] %s1614_s8 }
  0xe3   : > { %1297 = vmatpush3.bf16.msra.mxu1 %v1296_v30  ;;  %v1095_v14 = vld [vmem:[%s2284_s4] ss:$0 sm:$0xff]  ;;  %s1616_s23 = scalar_lea.vmem %s1615_s8, 256  ;;  %p1617_p13 = scmp.lt.s32.totalorder %s2163_s10, %s1615_s8 }
  0xe4   : > { %1276 = vmatpush3.bf16.msra.mxu0 %v1275_v27  ;;  %1298 = vmatprep.subr.bf16.mxu1 %v1758_v0  ;;  %p1618_p7 = scmp.lt.s32.totalorder %s1616_s23, %s1610_s13 }
  0xe5   : > { %1277 = vmatprep.subr.bf16.mxu0 %v1758_v0 }
  0xe6   : > { %p1619_p3 = por %p1618_p7, %p1617_p13 }
  0xe7   : > { %1300 = vmatpush3.bf16.msra.mxu1 %v1299_v36 }
  0xe8   : > { %1279 = vmatpush3.bf16.msra.mxu0 %v1278_v33  ;;  %1301 = vmatprep.subr.bf16.mxu1 %v1758_v0  ;;  %p1620_p5 = pnand %p1619_p3, %p1613_p9 }
  0xe9   : > { %1280 = vmatprep.subr.bf16.mxu0 %v1758_v0 }
  0xeb   : > { %1303 = vmatpush3.bf16.msra.mxu1 %v1302_v42 }
  0xec   : > { %1282 = vmatpush3.bf16.msra.mxu0 %v1281_v39  ;;  %1304 = vmatprep.subr.bf16.mxu1 %v1758_v0 }
  0xed   : > { %1283 = vmatprep.subr.bf16.mxu0 %v1758_v0 }
  0xef   : > { %1306 = vmatpush3.bf16.msra.mxu1 %v1305_v48 }
  0xf0   : > { %1285 = vmatpush3.bf16.msra.mxu0 %v1284_v45  ;;  %1307 = vmatprep.subr.bf16.mxu1 %v1758_v0 }
  0xf1   : > { %1310 = vmatprep.subr.bf16.mxu0 %v1758_v0 }
  0xf3   : > { %1190 = vmatmul.mubr.f32.vlgmr.msra.gmra.mrb[0].mxu0 %v535_v51  ;;  %1309 = vmatpush3.bf16.msra.mxu1 %v1308_v55 }
  0xf4   : > { %1312 = vmatpush3.bf16.msra.mxu0 %v1311_v52  ;;  %1259 = vmatprep.mubr.msk.f32.mxu0 %vm1759_vm0, %v1760_v1  ;;  %v735_v1 = vld [vmem:[#allocation11 + $0x48] sm:$0xff] }
  0xf5   : > { %1313 = vmatprep.subr.bf16.mxu0 %v1758_v0  ;;  %v1323_v3 = vpack.c.bf16 %v735_v1, %v734_v2 }
  0xf6   : > { %1225 = vmatmul.mubr.f32.vlgmr.msra.gmra.mrb[0].mxu1 %v630_v59 }
  0xf8   : > { %1315 = vmatpush3.bf16.msra.mxu0 %v1314_v56 }
  0xf9   : > { %1316 = vmatprep.subr.bf16.mxu0 %v1758_v0 }
  0xfc   : > { %1318 = vmatpush3.bf16.msra.mxu0 %v1317_v60 }
  0xfd   : > { %1319 = vmatprep.subr.bf16.mxu0 %v1758_v0 }
 0x100   : > { %1321 = vmatpush3.bf16.msra.mxu0 %v1320_v63 }
 0x101   : > { %1322 = vmatprep.subr.bf16.mxu0 %v1758_v0 }
 0x104   : > { %1324 = vmatpush3.bf16.msra.mxu0 %v1323_v3 }
 0x105   : > { %1325 = vmatprep.subr.bf16.mxu0 %v1758_v0 }
 0x108   : > { %1327 = vmatpush3.bf16.msra.mxu0 %v1326_v6 }
 0x109   : > { %1328 = vmatprep.subr.bf16.mxu0 %v1758_v0 }
 0x10c   : > { %1330 = vmatpush3.bf16.msra.mxu0 %v1329_v9 }
 0x10d   : > { %1331 = vmatprep.subr.bf16.mxu0 %v1758_v0  ;;  %v1096_v0 = vld [vmem:[%s2358_s12] ss:$0 sm:$0xff] }
 0x110   : > { %1333 = vmatpush3.bf16.msra.mxu0 %v1332_v12 }
 0x113   : > { %1260 = vmatmul.mubr.f32.vlgmr.msra.gmra.mrb[2].mxu0 %v725_v13 }
 0x1c6   : > { %v625_v15 = vpop.f32.mrb[0].mxu0 }
 0x1c7   : > { %v626_v16 = vadd.f32 %v1095_v14, %v625_v15  ;;  %v1191_v17 = vpop.f32.mrb[1].mxu0 }
 0x1c9   : > { %629 = vst [vmem:[%s520_s17] sm:$0xff] %v626_v16 }
 0x1ca   : > { %1623 = shalt.err (!%p1620_p5)
}
 0x1cb   : > { %s1624_s16 = scalar_lea.hbm %s2161_s22, 128  ;;  %s1628_s15 = scalar_lea.hbm %s2357_s9, 256 }
 0x1cc   : > { %p1625_p2 = scmp.ne.s32.totalorder %s2161_s22, %s1624_s16  ;;  %p1629_p12 = scmp.lt.u32.totalorder %s2161_s22, %s2357_s9 }
 0x1cd   : > { %p1630_p1 = scmp.lt.u32.totalorder %s1628_s15, %s1624_s16  ;;  %p1632_p10 = scmp.lt.u32.totalorder %s1624_s16, %s2161_s22 }
 0x1ce   : > { %p1626_p8 = pnand %p1625_p2, %p2359_p0 }
 0x1cf   : > { %p1631_p6 = por %p1630_p1, %p1629_p12 }
 0x1d0   : > { %p1627_p11 = pneg %p1626_p8 }
 0x1d1   : > { %p1633_p4 = por %p1632_p10, %p1631_p6 }
 0x1d3   : > { %p1634_p9 = pnand %p1633_p4, %p1627_p11 }
 0x1d5   : > { %1637 = shalt.err (!%p1634_p9)
}
 0x1d6   : > { %1352 = dma.vmem_to_hbm [thread:$0]  (%p2359_p0), %s2163_s10, 128, %s2161_s22, %s821_s28   ;;  %v720_v18 = vpop.f32.mrb[0].mxu1 }
 0x1d7   : > { %v721_v19 = vadd.f32 %v1096_v0, %v720_v18  ;;  %v1226_v20 = vpop.f32.mrb[1].mxu1  ;;  %s2360_s12 = sld [smem:[#allocation33_spill]]  ;;  %s2208_s27 = scalar_lea.sflag [#allocation15], %s451_s25 }
 0x1d8   : > { %s1638_s8 = scalar_lea.vmem %s2202_s3, 128  ;;  %s1762_s10 = smov [#allocation14]  }
 0x1d9   : > { %724 = vst [vmem:[%s527_s1] sm:$0xff] %v721_v19  ;;  %p1639_p13 = scmp.ne.s32.totalorder %s2202_s3, %s1638_s8  ;;  %s1642_s22 = sshll.u32 %s1762_s10, 4  ;;  %s1643_s22 = int_to_ptr.vmem [resolvable:$false] %s1642_s22 }
 0x1da   : > { %s1644_s28 = scalar_lea.vmem %s1643_s22, 256  ;;  %p1645_p5 = scmp.lt.s32.totalorder %s2202_s3, %s1643_s22 }
 0x1db   : > { %p1640_p7 = pnand %p1639_p13, %p2359_p0  ;;  %p1646_p2 = scmp.lt.s32.totalorder %s1644_s28, %s1638_s8 }
 0x1dd   : > { %s2199_s13 = scalar_lea.hbm %s2360_s12, %s2154_s30  ;;  %p1641_p3 = pneg %p1640_p7 }
 0x1de   : > { %p1647_p8 = por %p1646_p2, %p1645_p5 }
 0x1e0   : > { %p1648_p11 = pnand %p1647_p8, %p1641_p3 }
 0x1e2   : > { %1651 = shalt.err (!%p1648_p11)
}
 0x1e3   : > { %s1652_s21 = scalar_lea.hbm %s2199_s13, 128  ;;  %s1656_s23 = scalar_lea.hbm %s2360_s12, 256 }
 0x1e4   : > { %p1653_p12 = scmp.ne.s32.totalorder %s2199_s13, %s1652_s21  ;;  %p1657_p10 = scmp.lt.u32.totalorder %s2199_s13, %s2360_s12 }
 0x1e5   : > { %p1658_p4 = scmp.lt.u32.totalorder %s1656_s23, %s1652_s21  ;;  %p1660_p13 = scmp.lt.u32.totalorder %s1652_s21, %s2199_s13 }
 0x1e6   : > { %p1654_p1 = pnand %p1653_p12, %p2359_p0 }
 0x1e7   : > { %p1659_p9 = por %p1658_p4, %p1657_p10 }
 0x1e8   : > { %p1655_p6 = pneg %p1654_p1 }
 0x1e9   : > { %p1661_p7 = por %p1660_p13, %p1659_p9 }
 0x1eb   : > { %p1662_p3 = pnand %p1661_p7, %p1655_p6 }
 0x1ed   : > { %1665 = shalt.err (!%p1662_p3)
}
 0x1ee   : > { %1353 = dma.vmem_to_hbm [thread:$0]  (%p2359_p0), %s2202_s3, 128, %s2199_s13, %s2208_s27   ;;  %v815_v22 = vpop.f32.mrb[2].mxu0 }
 0x1ef   : > { %s2361_s6 = sld [smem:[#allocation31_spill]]  ;;  %s534_s20 = scalar_lea.vmem [#allocation16], %s2089_s29  ;;  %v1261_v24 = vpop.f32.mrb[3].mxu0 }
 0x1f0   : > { %s870_s11 = sshll.u32 %s534_s20, 4  ;;  %s2362_s10 = sld [smem:[#allocation34_spill]]  ;;  %s871_s11 = int_to_ptr.vmem [resolvable:$true] %s870_s11 }
 0x1f1   : > { %s1666_s28 = scalar_lea.vmem %s871_s11, 128  ;;  %s1763_s3 = smov [#allocation16]  }
 0x1f2   : > { %p1667_p5 = scmp.ne.s32.totalorder %s871_s11, %s1666_s28  ;;  %s1670_s13 = sshll.u32 %s1763_s3, 4  ;;  %s1671_s13 = int_to_ptr.vmem [resolvable:$false] %s1670_s13 }
 0x1f3   : > { %s1672_s29 = scalar_lea.vmem %s1671_s13, 256  ;;  %p1673_p11 = scmp.lt.s32.totalorder %s871_s11, %s1671_s13 }
 0x1f4   : > { %p1668_p2 = pnand %p1667_p5, %p2359_p0  ;;  %p1674_p12 = scmp.lt.s32.totalorder %s1672_s29, %s1666_s28 }
 0x1f5   : > { %v1097_v21 = vld [vmem:[%s2361_s6] ss:$0 sm:$0xff] }
 0x1f6   : > { %v816_v23 = vadd.f32 %v1097_v21, %v815_v22  ;;  %s2240_s22 = scalar_lea.hbm %s2362_s10, %s2154_s30  ;;  %p1669_p8 = pneg %p1668_p2 }
 0x1f7   : > { %p1675_p1 = por %p1674_p12, %p1673_p11 }
 0x1f8   : > { %819 = vst [vmem:[%s534_s20] sm:$0xff] %v816_v23 }
 0x1f9   : > { %p1676_p6 = pnand %p1675_p1, %p1669_p8 }
 0x1fb   : > { %1679 = shalt.err (!%p1676_p6)
}
 0x1fc   : > { %s1680_s30 = scalar_lea.hbm %s2240_s22, 128  ;;  %s1684_s1 = scalar_lea.hbm %s2362_s10, 256 }
 0x1fd   : > { %p1681_p10 = scmp.ne.s32.totalorder %s2240_s22, %s1680_s30  ;;  %p1685_p13 = scmp.lt.u32.totalorder %s2240_s22, %s2362_s10 }
 0x1fe   : > { %p1686_p7 = scmp.lt.u32.totalorder %s1684_s1, %s1680_s30  ;;  %p1688_p5 = scmp.lt.u32.totalorder %s1680_s30, %s2240_s22 }
 0x1ff   : > { %p1682_p4 = pnand %p1681_p10, %p2359_p0 }
 0x200   : > { %p1687_p3 = por %p1686_p7, %p1685_p13 }
 0x201   : > { %p1683_p9 = pneg %p1682_p4 }
 0x202   : > { %p1689_p2 = por %p1688_p5, %p1687_p3 }
 0x204   : > { %p1690_p8 = pnand %p1689_p2, %p1683_p9 }
 0x206   : > { %1693 = shalt.err (!%p1690_p8)
}
 0x207   : > { %1354 = dma.vmem_to_hbm [thread:$0]  (%p2359_p0), %s871_s11, 128, %s2240_s22, %s2208_s27  }
 0x208 PF: > { %s2363_s24 = sld [smem:[#allocation23_spill]]  ;;  %s2364_s17 = sld [smem:[#allocation25_spill]] }
 0x209   : > { %s2365_s15 = sld [smem:[#allocation24_spill]] }
 0x20e   : > { %s882_s6 = sand.u32 1, %s2363_s24   ;;  %p2366_p11 = scmp.ne.s32.totalorder %s2364_s17, 0 }
 0x20f   : > { %p2367_p12 = scmp.ge.s32.totalorder %s2365_s15, 2  ;;  %s883_s20 = scalar_lea.sflag [#allocation4], %s882_s6 }
 0x211   : > { %p1379_p1 = pnand %p2367_p12, %p2366_p11 }
 0x213   : > { %1727 = dma.done.wait (!%p1379_p1), %s883_s20, 128  }
 0x214   : > { %1729 = vsyncadd (!%p1379_p1), %s883_s20, 4294967168  ;;  %s2368_s14 = sadd.s32 4294967294, %s2365_s15  }
 0x215   : > { %s891_s8 = sand.u32 1, %s2368_s14  }
 0x216   : > { %s892_s28 = scalar_lea.sflag [#allocation15], %s891_s8 }
 0x217   : > { %1731 = dma.done.wait (!%p1379_p1), %s892_s28, 256  }
 0x218   : > { %1733 = vsyncadd (!%p1379_p1), %s892_s28, 4294967040  ;;  %s2369_s20 = sld [smem:[#allocation26_spill]]  ;;  %s2370_s26 = sld [smem:[#allocation27_spill]] }
 0x219   : > { %s2371_s17 = smov %s1740_s18  ;;  %s2372_s18 = smov %s1744_s19 }
 0x21e   : > { %p33_p0 = scmp.ge.s32.totalorder %s2369_s20, 4   ;;  %s2373_s19 = smov %s2370_s26 }
 0x220   :  { %35 = sbr.rel (!%p33_p0) target bundleno = 19 (0x13), region = 169 }
 0x227   :  { %906 = vsyncpa [#allocation3], 1 }
 0x228   :  { %908 = vsyncpa [#allocation3 + $0x1], 1 }
 0x229   :  { %909 = vsyncpa [#allocation6], 1 }
 0x22a   :  { %911 = vsyncpa [#allocation6 + $0x1], 1 }
 0x22b   :  { %912 = vsyncpa [#allocation9], 1 }
 0x22c   :  { %913 = vsyncpa [#allocation12], 1 }
 0x22d   :  { %914 = vsyncpa [#allocation4], 1 }
 0x22e   :  { %916 = vsyncpa [#allocation4 + $0x1], 1 }
 0x22f   :  { %917 = vsyncpa [#allocation15], 1 }
 0x230   :  { %919 = vsyncpa [#allocation15 + $0x1], 1 }

</bundles_post_ra>
